<compile_context>
chip_gen: v7x
topology: tpu7x:2x2x1
jax: 0.10.0
libtpu: 0.0.40
codegen_flags: <defaults>
</compile_context>

<pallas_src>
import functools

import jax
import jax.numpy as jnp
from jax.experimental import pallas as pl
from jax.experimental.pallas import tpu as pltpu


_LANES = 512                         # lane-axis width per block (multiple of 128)
_TARGET_TILE_BYTES = 2 * 1024 * 1024  # ~2 MiB per input tile


def _cdiv(a, b):
    return -(-a // b)


def _round_up(a, b):
    return _cdiv(a, b) * b


def _disc_loss_kernel(x_ref, t_ref, o_ref, acc_ref, *, n_sources, gamma):
    """Grid = (parallel_slices, seq_blocks).

    x_ref, t_ref: (S, BM, LANES) tiles (source-major, lane-dense).
    acc_ref:      (BM, LANES) f32 VMEM accumulator (per parallel slice).
    o_ref:        (1, 1) f32 SMEM partial sum for this parallel slice.
    """
    k = pl.program_id(1)

    @pl.when(k == 0)
    def _():
        acc_ref[...] = jnp.zeros_like(acc_ref)

    # Unrolled O(S) pass over dense (BM, LANES) per-source slabs.
    t0 = t_ref[0].astype(jnp.float32)
    x0 = x_ref[0].astype(jnp.float32)
    d0 = t0 - x0
    diag = d0 * d0          # sum_i (t_i - x_i)^2
    sq_t = t0 * t0          # sum_i t_i^2
    sq_x = x0 * x0          # sum_j x_j^2
    t_sum = t0              # sum_i t_i
    x_sum = x0              # sum_j x_j
    for i in range(1, n_sources):
        ti = t_ref[i].astype(jnp.float32)
        xi = x_ref[i].astype(jnp.float32)
        di = ti - xi
        diag = diag + di * di
        sq_t = sq_t + ti * ti
        sq_x = sq_x + xi * xi
        t_sum = t_sum + ti
        x_sum = x_sum + xi

    g = jnp.float32(gamma)
    s_f = jnp.float32(n_sources)
    # (1+g)*diag - g*(S*sum t^2 + S*sum x^2 - 2*T*X)  ==  per-pixel sum_mtr
    block_val = (1.0 + g) * diag - g * (s_f * (sq_t + sq_x)
                                        - 2.0 * t_sum * x_sum)

    acc_ref[...] += block_val

    @pl.when(k == pl.num_programs(1) - 1)
    def _():
        o_ref[0, 0] = jnp.sum(acc_ref[...])


def discriminative_loss(inp, tgt, gamma=0.1, *, lanes=_LANES, num_parallel=2):
    """inp, tgt: (B, C, H, W, S) float tensors. Returns scalar float32 loss."""
    assert inp.shape == tgt.shape
    s = inp.shape[-1]
    m = 1
    for d in inp.shape[:-1]:
        m *= d

    # Sublane block rows: ~2 MiB per input tile, multiple of 8.
    bm_cap = max(8, (_TARGET_TILE_BYTES // (s * lanes * 4)) // 8 * 8)
    rows = _cdiv(m, lanes)
    bm = min(bm_cap, _round_up(rows, 8))

    blocks = _cdiv(rows, bm)
    g_par = max(1, min(num_parallel, blocks))   # leading "parallel" axis (2 TCs on v7x)
    g_seq = _cdiv(blocks, g_par)                # trailing reduction axis
    rows_pad = g_par * g_seq * bm
    m_pad = rows_pad * lanes

    # (B, C, H, W, S) -> (S, M): one XLA transpose so per-source slabs are
    # contiguous & lane-dense.  Zero-pad only if the pixel count doesn't divide
    # (zeros contribute exactly 0 to every term); divisor uses the true m.
    # TODO(synk): the one-time transpose could be removed with an
    # interleaved-lane variant (even/odd pltpu.roll) specialized to S==2.
    x2 = jnp.moveaxis(inp, -1, 0).reshape(s, m)
    t2 = jnp.moveaxis(tgt, -1, 0).reshape(s, m)
    if m_pad != m:
        x2 = jnp.pad(x2, ((0, 0), (0, m_pad - m)))
        t2 = jnp.pad(t2, ((0, 0), (0, m_pad - m)))
    x3 = x2.reshape(s, rows_pad, lanes)
    t3 = t2.reshape(s, rows_pad, lanes)

    kernel = functools.partial(_disc_loss_kernel, n_sources=s, gamma=gamma)

    def in_map(p, k):
        return (0, p * g_seq + k, 0)

    partials = pl.pallas_call(
        kernel,
        out_shape=jax.ShapeDtypeStruct((g_par, 1), jnp.float32),
        grid_spec=pltpu.PrefetchScalarGridSpec(
            num_scalar_prefetch=0,
            grid=(g_par, g_seq),
            in_specs=[
                pl.BlockSpec((s, bm, lanes), in_map),
                pl.BlockSpec((s, bm, lanes), in_map),
            ],
            out_specs=pl.BlockSpec(
                (1, 1), lambda p, k: (p, 0),
                memory_space=pltpu.MemorySpace.SMEM),
            scratch_shapes=[pltpu.VMEM((bm, lanes), jnp.float32)],
        ),
        compiler_params=pltpu.CompilerParams(
            dimension_semantics=("parallel", "arbitrary")),
    )(x3, t3)

    return jnp.sum(partials) / jnp.float32(m)


def _reference_loss(inp, tgt, gamma=0.1):
    s = inp.shape[-1]
    sum_mtr = jnp.zeros(inp.shape[:-1], jnp.float32)
    for i in range(s):
        sum_mtr = sum_mtr + (tgt[..., i] - inp[..., i]) ** 2
        for j in range(s):
            if i != j:
                sum_mtr = sum_mtr - gamma * (tgt[..., i] - inp[..., j]) ** 2
    return jnp.mean(sum_mtr.reshape(-1))


if __name__ == "__main__":
    key = jax.random.PRNGKey(0)
    k1, k2 = jax.random.split(key)
    B, C, H, W, S = 2, 4, 16, 16, 2
    x = jax.random.normal(k1, (B, C, H, W, S), dtype=jnp.float32)
    t = jax.random.normal(k2, (B, C, H, W, S), dtype=jnp.float32)

    loss_fn = jax.jit(functools.partial(discriminative_loss, gamma=0.1))
    loss = jax.block_until_ready(loss_fn(x, t))
    ref = jax.block_until_ready(_reference_loss(x, t, gamma=0.1))

    assert jnp.allclose(loss, ref, rtol=1e-4, atol=1e-5), (loss, ref)
    print("KERNEL_OK")
</pallas_src>

<mosaic_0001>
module attributes {stable_mosaic.version = 11 : i64} {
  func.func @_disc_loss_kernel(%arg0: i32, %arg1: i32, %arg2: memref<2x8x512xf32, #tpu.memory_space<vmem>>, %arg3: memref<2x8x512xf32, #tpu.memory_space<vmem>>, %arg4: memref<1x1xf32, #tpu.memory_space<smem>>, %arg5: memref<8x512xf32, #tpu.memory_space<vmem>>) attributes {dimension_semantics = [#tpu.dimension_semantics<parallel>, #tpu.dimension_semantics<arbitrary>], iteration_bounds = array<i64: 1, 1>, scalar_prefetch = 0 : i64, scratch_operands = 1 : i64, tpu.core_type = #tpu.core_type<tc>, window_params = [{transform_indices = @transform_0, window_bounds = array<i64: 2, 8, 512>}, {transform_indices = @transform_1, window_bounds = array<i64: 2, 8, 512>}, {transform_indices = @transform_2, window_bounds = array<i64: 1, 1>}]} {
    %c0_i32 = arith.constant 0 : i32
    %0 = arith.cmpi eq, %arg1, %c0_i32 : i32
    %1 = arith.extui %0 : i1 to i32
    %c0_i32_0 = arith.constant 0 : i32
    %2 = arith.cmpi ne, %1, %c0_i32_0 : i32
    scf.if %2 {
      %cst_21 = arith.constant 0.000000e+00 : f32
      %43 = vector.broadcast %cst_21 : f32 to vector<8x512xf32>
      %c0_22 = arith.constant 0 : index
      %c0_23 = arith.constant 0 : index
      %44 = vector.load %arg5[%c0_22, %c0_23] : memref<8x512xf32, #tpu.memory_space<vmem>>, vector<8x512xf32>
      tpu.vector_store %arg5[%c0_22, %c0_23], %43 {strides = array<i32>} : memref<8x512xf32, #tpu.memory_space<vmem>>, vector<8x512xf32>,
    } else {
    }
    %c0 = arith.constant 0 : index
    %c0_1 = arith.constant 0 : index
    %c0_2 = arith.constant 0 : index
    %3 = vector.load %arg3[%c0, %c0_1, %c0_2] : memref<2x8x512xf32, #tpu.memory_space<vmem>>, vector<1x8x512xf32>
    %4 = vector.shape_cast %3 : vector<1x8x512xf32> to vector<8x512xf32>
    %c0_3 = arith.constant 0 : index
    %c0_4 = arith.constant 0 : index
    %c0_5 = arith.constant 0 : index
    %5 = vector.load %arg2[%c0_3, %c0_4, %c0_5] : memref<2x8x512xf32, #tpu.memory_space<vmem>>, vector<1x8x512xf32>
    %6 = vector.shape_cast %5 : vector<1x8x512xf32> to vector<8x512xf32>
    %7 = arith.subf %4, %6 : vector<8x512xf32>
    %8 = arith.mulf %7, %7 : vector<8x512xf32>
    %9 = arith.mulf %4, %4 : vector<8x512xf32>
    %10 = arith.mulf %6, %6 : vector<8x512xf32>
    %c1 = arith.constant 1 : index
    %c0_6 = arith.constant 0 : index
    %c0_7 = arith.constant 0 : index
    %11 = vector.load %arg3[%c1, %c0_6, %c0_7] : memref<2x8x512xf32, #tpu.memory_space<vmem>>, vector<1x8x512xf32>
    %12 = vector.shape_cast %11 : vector<1x8x512xf32> to vector<8x512xf32>
    %c1_8 = arith.constant 1 : index
    %c0_9 = arith.constant 0 : index
    %c0_10 = arith.constant 0 : index
    %13 = vector.load %arg2[%c1_8, %c0_9, %c0_10] : memref<2x8x512xf32, #tpu.memory_space<vmem>>, vector<1x8x512xf32>
    %14 = vector.shape_cast %13 : vector<1x8x512xf32> to vector<8x512xf32>
    %15 = arith.subf %12, %14 : vector<8x512xf32>
    %16 = arith.mulf %15, %15 : vector<8x512xf32>
    %17 = arith.addf %8, %16 : vector<8x512xf32>
    %18 = arith.mulf %12, %12 : vector<8x512xf32>
    %19 = arith.addf %9, %18 : vector<8x512xf32>
    %20 = arith.mulf %14, %14 : vector<8x512xf32>
    %21 = arith.addf %10, %20 : vector<8x512xf32>
    %22 = arith.addf %4, %12 : vector<8x512xf32>
    %23 = arith.addf %6, %14 : vector<8x512xf32>
    %cst = arith.constant 1.000000e+00 : f32
    %cst_11 = arith.constant 1.000000e-01 : f32
    %24 = arith.addf %cst, %cst_11 : f32
    %25 = vector.broadcast %24 : f32 to vector<8x512xf32>
    %26 = arith.mulf %25, %17 : vector<8x512xf32>
    %27 = arith.addf %19, %21 : vector<8x512xf32>
    %cst_12 = arith.constant 2.000000e+00 : f32
    %28 = vector.broadcast %cst_12 : f32 to vector<8x512xf32>
    %29 = arith.mulf %28, %27 : vector<8x512xf32>
    %cst_13 = arith.constant 2.000000e+00 : f32
    %30 = vector.broadcast %cst_13 : f32 to vector<8x512xf32>
    %31 = arith.mulf %30, %22 : vector<8x512xf32>
    %32 = arith.mulf %31, %23 : vector<8x512xf32>
    %33 = arith.subf %29, %32 : vector<8x512xf32>
    %cst_14 = arith.constant 1.000000e-01 : f32
    %34 = vector.broadcast %cst_14 : f32 to vector<8x512xf32>
    %35 = arith.mulf %34, %33 : vector<8x512xf32>
    %36 = arith.subf %26, %35 : vector<8x512xf32>
    %c0_15 = arith.constant 0 : index
    %c0_16 = arith.constant 0 : index
    %37 = vector.load %arg5[%c0_15, %c0_16] : memref<8x512xf32, #tpu.memory_space<vmem>>, vector<8x512xf32>
    %38 = arith.addf %37, %36 : vector<8x512xf32>
    %c0_17 = arith.constant 0 : index
    %c0_18 = arith.constant 0 : index
    %39 = vector.load %arg5[%c0_17, %c0_18] : memref<8x512xf32, #tpu.memory_space<vmem>>, vector<8x512xf32>
    tpu.vector_store %arg5[%c0_17, %c0_18], %38 {strides = array<i32>} : memref<8x512xf32, #tpu.memory_space<vmem>>, vector<8x512xf32>,
    %c0_i32_19 = arith.constant 0 : i32
    %40 = arith.cmpi eq, %arg1, %c0_i32_19 : i32
    %41 = arith.extui %40 : i1 to i32
    %c0_i32_20 = arith.constant 0 : i32
    %42 = arith.cmpi ne, %41, %c0_i32_20 : i32
    scf.if %42 {
      %c0_21 = arith.constant 0 : index
      %c0_22 = arith.constant 0 : index
      %43 = vector.load %arg5[%c0_21, %c0_22] : memref<8x512xf32, #tpu.memory_space<vmem>>, vector<8x512xf32>
      %44 = vector.shape_cast %43 : vector<8x512xf32> to vector<1x8x512xf32>
      %cst_23 = arith.constant dense<0.000000e+00> : vector<1xf32>
      %45 = vector.multi_reduction <add>, %44, %cst_23 [1, 2] : vector<1x8x512xf32> to vector<1xf32>
      %46 = vector.shape_cast %45 : vector<1xf32> to vector<1x1x1xf32>
      %47 = vector.extract %46[0, 0, 0] : f32 from vector<1x1x1xf32>
      %c0_24 = arith.constant 0 : index
      %c0_25 = arith.constant 0 : index
      %48 = memref.load %arg4[%c0_24, %c0_25] : memref<1x1xf32, #tpu.memory_space<smem>>
      memref.store %47, %arg4[%c0_24, %c0_25] : memref<1x1xf32, #tpu.memory_space<smem>>
    } else {
    }
    return
  }
  func.func @transform_0(%arg0: i32, %arg1: i32) -> (i32, i32, i32) {
    %c1_i32 = arith.constant 1 : i32
    %0 = arith.muli %arg0, %c1_i32 : i32
    %1 = arith.addi %0, %arg1 : i32
    %c0_i32 = arith.constant 0 : i32
    %c0_i32_0 = arith.constant 0 : i32
    %c0_i32_1 = arith.constant 0 : i32
    return %c0_i32, %1, %c0_i32_0 : i32, i32, i32
  }
  func.func @transform_1(%arg0: i32, %arg1: i32) -> (i32, i32, i32) {
    %c1_i32 = arith.constant 1 : i32
    %0 = arith.muli %arg0, %c1_i32 : i32
    %1 = arith.addi %0, %arg1 : i32
    %c0_i32 = arith.constant 0 : i32
    %c0_i32_0 = arith.constant 0 : i32
    %c0_i32_1 = arith.constant 0 : i32
    return %c0_i32, %1, %c0_i32_0 : i32, i32, i32
  }
  func.func @transform_2(%arg0: i32, %arg1: i32) -> (i32, i32) {
    %c0_i32 = arith.constant 0 : i32
    %c0_i32_0 = arith.constant 0 : i32
    return %arg0, %c0_i32 : i32, i32
  }
}

</mosaic_0001>

<bundles_post_ra>
// kernel: discriminative_loss.1
= control target key start
LH: loop header
LB: loop body
LE: loop exit
PB: predicated region body
PF: predicated region fallthrough
CT: control target
= control target key end

     0   :  { %s319_s0 = inlined_call_operand.vmem [shape: f32[2,8,512], index: 0, kind: input, shape index: {}]   ;;  %s320_s1 = inlined_call_operand.vmem [shape: f32[2,8,512], index: 1, kind: input, shape index: {}]   ;;  %s321_s2 = inlined_call_operand.hbm [shape: f32[1,1], index: 2, kind: output, shape index: {}]  }
   0x1   :  { %v60_v0 = vld [vmem:[%s320_s1] sm:$0xff]  ;;  %v61_v1 = vld [vmem:[%s320_s1 + $0x8] sm:$0xff]  ;;  %v62_v2 = vld [vmem:[%s320_s1 + $0x10] sm:$0xff] }
   0x2   :  { %v63_v3 = vld [vmem:[%s320_s1 + $0x18] sm:$0xff]  ;;  %v64_v4 = vld [vmem:[%s319_s0] sm:$0xff]  ;;  %v65_v5 = vld [vmem:[%s319_s0 + $0x8] sm:$0xff]  ;;  %v76_v8 = vmul.f32 %v60_v0, %v60_v0  ;;  %v77_v9 = vmul.f32 %v61_v1, %v61_v1  ;;  %v78_v13 = vmul.f32 %v62_v2, %v62_v2 }
   0x3   :  { %v66_v6 = vld [vmem:[%s319_s0 + $0x10] sm:$0xff]  ;;  %v68_v7 = vsub.f32 %v60_v0, %v64_v4  ;;  %v220_v10 = vld [vmem:[%s320_s1 + $0x20] sm:$0xff]  ;;  %v67_v11 = vld [vmem:[%s319_s0 + $0x18] sm:$0xff]  ;;  %v69_v12 = vsub.f32 %v61_v1, %v65_v5  ;;  %v79_v14 = vmul.f32 %v63_v3, %v63_v3  ;;  %v80_v15 = vmul.f32 %v64_v4, %v64_v4 }
   0x4   :  { %v221_v16 = vld [vmem:[%s320_s1 + $0x28] sm:$0xff]  ;;  %v222_v17 = vld [vmem:[%s320_s1 + $0x30] sm:$0xff]  ;;  %v70_v18 = vsub.f32 %v62_v2, %v66_v6  ;;  %v71_v19 = vsub.f32 %v63_v3, %v67_v11  ;;  %v81_v20 = vmul.f32 %v65_v5, %v65_v5  ;;  %v223_v21 = vld [vmem:[%s320_s1 + $0x38] sm:$0xff]  ;;  %v106_v24 = vmul.f32 %v220_v10, %v220_v10 }
   0x5   :  { %v224_v22 = vld [vmem:[%s319_s0 + $0x20] sm:$0xff]  ;;  %v225_v23 = vld [vmem:[%s319_s0 + $0x28] sm:$0xff]  ;;  %v72_v25 = vmul.f32 %v68_v7, %v68_v7  ;;  %v82_v26 = vmul.f32 %v66_v6, %v66_v6  ;;  %v226_v27 = vld [vmem:[%s319_s0 + $0x30] sm:$0xff] }
   0x6   :  { %v227_v28 = vld [vmem:[%s319_s0 + $0x38] sm:$0xff]  ;;  %v94_v29 = vsub.f32 %v220_v10, %v224_v22  ;;  %v95_v30 = vsub.f32 %v221_v16, %v225_v23 }
   0x7   :  { %7 = vsyncpa [#allocation4], 0  ;;  %v96_v31 = vsub.f32 %v222_v17, %v226_v27  ;;  %v97_v32 = vsub.f32 %v223_v21, %v227_v28  ;;  %v107_v33 = vmul.f32 %v221_v16, %v221_v16  ;;  %v108_v34 = vmul.f32 %v222_v17, %v222_v17  ;;  %s231_s14 = scalar_lea.hbm %s321_s2, 16 }
   0x8   :  { %v73_v35 = vmul.f32 %v69_v12, %v69_v12  ;;  %v83_v36 = vmul.f32 %v67_v11, %v67_v11  ;;  %v98_v37 = vmul.f32 %v94_v29, %v94_v29  ;;  %v109_v38 = vmul.f32 %v223_v21, %v223_v21  ;;  %p232_p0 = scmp.ne.s32.totalorder %s321_s2, %s231_s14  ;;  %p235_p1 = scmp.lt.u32.totalorder %s231_s14, %s321_s2 }
   0x9   :  { %v74_v39 = vmul.f32 %v70_v18, %v70_v18  ;;  %v75_v40 = vmul.f32 %v71_v19, %v71_v19  ;;  %v99_v41 = vmul.f32 %v95_v30, %v95_v30  ;;  %v110_v42 = vadd.f32 %v106_v24, %v76_v8 }
   0xa   :  { %v100_v43 = vmul.f32 %v96_v31, %v96_v31  ;;  %v101_v44 = vmul.f32 %v97_v32, %v97_v32  ;;  %v111_v45 = vadd.f32 %v107_v33, %v77_v9  ;;  %v114_v46 = vmul.f32 %v224_v22, %v224_v22  ;;  %p237_p2 = pnand %p235_p1, %p232_p0 }
   0xb   :  { %v102_v47 = vadd.f32 %v98_v37, %v72_v25  ;;  %v112_v48 = vadd.f32 %v108_v34, %v78_v13  ;;  %v115_v49 = vmul.f32 %v225_v23, %v225_v23  ;;  %v116_v50 = vmul.f32 %v226_v27, %v226_v27 }
   0xc   :  { %v113_v51 = vadd.f32 %v109_v38, %v79_v14  ;;  %v117_v52 = vmul.f32 %v227_v28, %v227_v28  ;;  %v118_v53 = vadd.f32 %v114_v46, %v80_v15  ;;  %v122_v54 = vadd.f32 %v220_v10, %v60_v0 }
   0xd   :  { %v119_v55 = vadd.f32 %v115_v49, %v81_v20  ;;  %v120_v56 = vadd.f32 %v116_v50, %v82_v26  ;;  %v123_v57 = vadd.f32 %v221_v16, %v61_v1  ;;  %v124_v58 = vadd.f32 %v222_v17, %v62_v2 }
   0xe   :  { %v103_v59 = vadd.f32 %v99_v41, %v73_v35  ;;  %v104_v60 = vadd.f32 %v100_v43, %v74_v39  ;;  %v121_v61 = vadd.f32 %v117_v52, %v83_v36  ;;  %v125_v62 = vadd.f32 %v223_v21, %v63_v3 }
   0xf   :  { %v105_v63 = vadd.f32 %v101_v44, %v75_v40  ;;  %v126_v7 = vadd.f32 %v224_v22, %v64_v4  ;;  %v127_v8 = vadd.f32 %v225_v23, %v65_v5  ;;  %v128_v9 = vadd.f32 %v226_v27, %v66_v6 }
  0x10   :  { %v129_v12 = vadd.f32 %v227_v28, %v67_v11  ;;  %v134_v13 = vadd.f32 %v118_v53, %v110_v42  ;;  %v135_v18 = vadd.f32 %v119_v55, %v111_v45  ;;  %v136_v19 = vadd.f32 %v120_v56, %v112_v48 }
  0x11   :  { %v137_v14 = vadd.f32 %v121_v61, %v113_v51  ;;  %v142_v24 = vmul.f32 2.0, %v122_v54  ;;  %v143_v15 = vmul.f32 2.0, %v123_v57  ;;  %v144_v0 = vmul.f32 2.0, %v124_v58 }
  0x12   :  { %v138_v10 = vmul.f32 2.0, %v134_v13  ;;  %v139_v20 = vmul.f32 2.0, %v135_v18  ;;  %v140_v1 = vmul.f32 2.0, %v136_v19  ;;  %v145_v2 = vmul.f32 2.0, %v125_v62 }
  0x13   :  { %v141_v16 = vmul.f32 2.0, %v137_v14  ;;  %v146_v17 = vmul.f32 %v142_v24, %v126_v7  ;;  %v147_v25 = vmul.f32 %v143_v15, %v127_v8  ;;  %v148_v3 = vmul.f32 %v144_v0, %v128_v9 }
  0x14   :  { %v130_v21 = vmul.f32 1.1, %v102_v47  ;;  %v131_v4 = vmul.f32 1.1, %v103_v59  ;;  %v149_v5 = vmul.f32 %v145_v2, %v129_v12  ;;  %v132_v6 = vmul.f32 1.1, %v104_v60 }
  0x15   :  { %v150_v11 = vsub.f32 %v138_v10, %v146_v17  ;;  %v151_v22 = vsub.f32 %v139_v20, %v147_v25  ;;  %v152_v23 = vsub.f32 %v140_v1, %v148_v3  ;;  %v133_v26 = vmul.f32 1.1, %v105_v63 }
  0x16   :  { %v153_v27 = vsub.f32 %v141_v16, %v149_v5 }
  0x17   :  { %v154_v28 = vmul.f32 0.1, %v150_v11  ;;  %v155_v29 = vmul.f32 0.1, %v151_v22  ;;  %v156_v30 = vmul.f32 0.1, %v152_v23 }
  0x18   :  { %v157_v31 = vmul.f32 0.1, %v153_v27 }
  0x19   :  { %v158_v32 = vsub.f32 %v130_v21, %v154_v28  ;;  %v159_v33 = vsub.f32 %v131_v4, %v155_v29  ;;  %v160_v34 = vsub.f32 %v132_v6, %v156_v30 }
  0x1a   :  { %v161_v35 = vsub.f32 %v133_v26, %v157_v31 }
  0x1b   :  { %v181_v36 = vadd.f32 %v159_v33, %v158_v32 }
  0x1d   :  { %v182_v37 = vadd.f32 %v181_v36, %v160_v34 }
  0x1f   :  { %v183_v38 = vadd.f32 %v182_v37, %v161_v35 }
  0x21   :  { %184 = vadd.xlane.f32.xlu0 %v183_v38 }
  0xae   :  { %v185_v39 = vpop.xlane.xlu0 %184 }
  0xaf   :  { %v186_v40 = vrot.slane %v185_v39, 4 }
  0xb1   :  { %v187_v41 = vadd.f32 %v186_v40, %v185_v39 }
  0xb3   :  { %v188_v42 = vrot.slane %v187_v41, 2 }
  0xb5   :  { %v189_v43 = vadd.f32 %v188_v42, %v187_v41 }
  0xb7   :  { %v190_v44 = vrot.slane %v189_v43, 1 }
  0xb9   :  { %v191_v45 = vadd.f32 %v190_v44, %v189_v43 }
  0xbb   :  { %228 = vpush %v191_v45 }
  0xec   :  { %s229_s0 = spop %228 }
  0xed   :  { %194 = sst [smem:[#allocation3]] %s229_s0 }
  0xee   :  { %240 = shalt.err (!%p237_p2)
}
  0xef   :  { %s243_s19 = smov [#allocation3]  }
  0xf0   :  { %202 = dma.smem_to_hbm %s243_s19, 16, %s321_s2, [#allocation4]  }
  0xf1   :  { %241 = dma.done.wait [#allocation4], 16  }
  0xf2   :  { %242 = vsyncadd [#allocation4], 4294967280 }
  0xf3   :  { %206 = sfence }
  0xf4   :  { %207 = vsyncpa [#allocation4], 1 }

</bundles_post_ra>
